<compile_context>
chip_gen: v5e
topology: v5e:2x2
jax: 0.10.0
libtpu: 0.0.40
codegen_flags: <defaults>
</compile_context>

<pallas_src>
import functools

import jax
import jax.numpy as jnp
from jax.experimental import pallas as pl
from jax.experimental.pallas import tpu as pltpu

_LANE = 512                    # preferred lane-dense width (multiple of 128)
_SUBLANE = 8                   # f32 sublane tile
_MIN_PALLAS_BYTES = 1 << 20    # below ~1 MiB, fused XLA sigmoid wins


def _sigmoid_kernel(x_ref, o_ref, *, compute_dtype):
    """Elementwise sigmoid on one VMEM tile.

    exp and the reciprocal go to the EUP slot; only neg/add hit the VPU, so
    compute never becomes the exposed path even at large block sizes.
    """
    x = x_ref[...].astype(compute_dtype)
    denom = 1.0 + jnp.exp(-x)
    o_ref[...] = pl.reciprocal(denom, approx=False).astype(o_ref.dtype)


def _device_kind() -> str:
    try:
        return jax.devices()[0].device_kind.lower()
    except Exception:
        return ""


def _tpu_config(kind: str):
    """Per-generation block size / VMEM limit / grid-axis semantics."""
    vmem = None
    try:
        vmem = getattr(pltpu.get_tpu_info(), "vmem_capacity_bytes", None)
    except Exception:
        vmem = None
    if vmem is None:
        # Heuristic: v7x has 64 MiB VMEM per TC, earlier gens 128 MiB.
        vmem = (64 if ("v7" in kind or "7x" in kind) else 128) * 1024 * 1024

    if vmem >= 128 * 1024 * 1024:
        # v5e / v6e: 8 MiB blocks -> ~32 MiB in flight (double-buffered in+out).
        block_bytes = 8 * 1024 * 1024
        vmem_limit = 64 * 1024 * 1024
    else:
        # v7x: 4 MiB blocks -> ~16 MiB in flight, within the scoped limit.
        block_bytes = 4 * 1024 * 1024
        vmem_limit = 32 * 1024 * 1024

    if "v7" in kind or "7x" in kind:
        # 2 TensorCores per chip: actually shard grid steps across both cores.
        semantics = (pltpu.CORE_PARALLEL,)
    else:
        semantics = (pltpu.PARALLEL,)
    return block_bytes, vmem_limit, semantics


def _compute_dtype(dtype, kind: str):
    # v6e / v7x have bf16 VPU+EUP: compute natively, halving vreg traffic.
    # v5e has no bf16 vector units (and f32 inputs stay f32).
    if dtype == jnp.bfloat16 and "v5" not in kind:
        return jnp.bfloat16
    return jnp.float32


def _max_block_rows(lane: int, block_bytes: int) -> int:
    # Size blocks as if f32 (covers any in-kernel upcast); keep a multiple of 8.
    rows = (block_bytes // (lane * 4)) // _SUBLANE * _SUBLANE
    return max(_SUBLANE, rows)


def _choose_2d_layout(total: int, block_bytes: int):
    """Find a zero-copy (rows, lane, block_rows) view of the flat tensor.

    block_shape dims must be (8,128)-divisible OR equal the full array dims, so
    either rows % 8 == 0 (multi-step grid) or the whole slab is a single block.
    Returns None if no pad-free layout exists.
    """
    for lane in (_LANE, 256, 128):
        if total % lane != 0:
            continue
        rows = total // lane
        max_rows = _max_block_rows(lane, block_bytes)
        if rows % _SUBLANE == 0:
            return rows, lane, min(rows, max_rows)
        if rows <= max_rows:
            return rows, lane, rows          # single full-extent block
    return None


def _pallas_sigmoid_slab(x2d, block_rows, compute_dtype, vmem_limit, semantics):
    rows, lane = x2d.shape
    kernel = functools.partial(_sigmoid_kernel, compute_dtype=compute_dtype)
    return pl.pallas_call(
        kernel,
        out_shape=jax.ShapeDtypeStruct((rows, lane), x2d.dtype),
        grid=(pl.cdiv(rows, block_rows),),
        in_specs=[pl.BlockSpec((block_rows, lane), lambda i: (i, 0))],
        out_specs=pl.BlockSpec((block_rows, lane), lambda i: (i, 0)),
        compiler_params=pltpu.CompilerParams(
            dimension_semantics=semantics,
            vmem_limit_bytes=vmem_limit,
        ),
    )(x2d)


def tudui_forward(x: jax.Array, *, force_pallas: bool = False) -> jax.Array:
    """Tudui.forward: Sigmoid(x). (The module's ReLU layer is never called.)"""
    orig_shape = x.shape
    total = x.size
    if total == 0:
        return x

    # Tiny tensors: launch + grid-step overhead dominates; let XLA fuse it.
    if not force_pallas and total * x.dtype.itemsize < _MIN_PALLAS_BYTES:
        return jax.nn.sigmoid(x)

    kind = _device_kind()
    block_bytes, vmem_limit, semantics = _tpu_config(kind)
    compute_dtype = _compute_dtype(x.dtype, kind)

    flat = x.reshape(-1)  # contiguous flatten: layout-only, no extra HBM pass

    # Fast path: pad-free lane-dense view.
    layout = _choose_2d_layout(total, block_bytes)
    if layout is not None:
        rows, lane, block_rows = layout
        out2d = _pallas_sigmoid_slab(
            flat.reshape(rows, lane), block_rows, compute_dtype, vmem_limit, semantics
        )
        return out2d.reshape(orig_shape)

    # Ragged sizes: kernel on the (8*LANE)-aligned bulk, XLA sigmoid on the
    # small tail.  (Padding + slicing the whole tensor would add two full extra
    # HBM passes to a purely bandwidth-bound op.)
    chunk = _SUBLANE * _LANE
    bulk = (total // chunk) * chunk
    if bulk == 0:
        return jax.nn.sigmoid(x)
    rows = bulk // _LANE
    block_rows = min(rows, _max_block_rows(_LANE, block_bytes))
    bulk_out = _pallas_sigmoid_slab(
        flat[:bulk].reshape(rows, _LANE), block_rows, compute_dtype, vmem_limit, semantics
    )
    tail_out = jax.nn.sigmoid(flat[bulk:])
    return jnp.concatenate([bulk_out.reshape(-1), tail_out]).reshape(orig_shape)


if __name__ == "__main__":
    key = jax.random.PRNGKey(0)

    # Demo input consistent with the module usage (small NCHW tensor).
    x = jax.random.normal(key, (2, 4, 16, 16), dtype=jnp.float32)
    # The tiny demo shape would normally take the fused-XLA fast path; force
    # the Pallas kernel so it is actually exercised (single full-extent block).
    out = jax.block_until_ready(tudui_forward(x, force_pallas=True))
    ref = jax.nn.sigmoid(x)
    assert out.shape == x.shape and out.dtype == x.dtype
    assert float(jnp.max(jnp.abs(out - ref))) < 1e-5

    # Aligned large-tensor path (multi-step grid, zero pad/slice).
    xa = jax.random.normal(key, (16, 64, 64, 64), dtype=jnp.float32)
    outa = jax.block_until_ready(tudui_forward(xa))
    assert float(jnp.max(jnp.abs(outa - jax.nn.sigmoid(xa)))) < 1e-5

    # Ragged large-tensor path (kernel on the bulk, XLA on the tail).
    xr = jax.random.normal(key, (4, 8, 130, 257), dtype=jnp.float32)
    outr = jax.block_until_ready(tudui_forward(xr))
    assert float(jnp.max(jnp.abs(outr - jax.nn.sigmoid(xr)))) < 1e-5

    print("KERNEL_OK")
</pallas_src>

<mosaic_0001>
module attributes {stable_mosaic.version = 11 : i64} {
  func.func @_sigmoid_kernel(%arg0: i32, %arg1: memref<4x512xf32, #tpu.memory_space<vmem>>, %arg2: memref<4x512xf32, #tpu.memory_space<vmem>>) attributes {dimension_semantics = [#tpu.dimension_semantics<parallel>], iteration_bounds = array<i64: 1>, scalar_prefetch = 0 : i64, scratch_operands = 0 : i64, tpu.core_type = #tpu.core_type<tc>, window_params = [{transform_indices = @transform_0, window_bounds = array<i64: 4, 512>}, {transform_indices = @transform_1, window_bounds = array<i64: 4, 512>}]} {
    %c0 = arith.constant 0 : index
    %c0_0 = arith.constant 0 : index
    %0 = vector.load %arg1[%c0, %c0_0] : memref<4x512xf32, #tpu.memory_space<vmem>>, vector<4x512xf32>
    %cst = arith.constant 0.000000e+00 : f32
    %1 = vector.broadcast %cst : f32 to vector<4x512xf32>
    %2 = arith.subf %1, %0 : vector<4x512xf32>
    %3 = math.exp %2 : vector<4x512xf32>
    %cst_1 = arith.constant 1.000000e+00 : f32
    %4 = vector.broadcast %cst_1 : f32 to vector<4x512xf32>
    %5 = arith.addf %4, %3 : vector<4x512xf32>
    %6 = tpu.reciprocal %5 : vector<4x512xf32> -> vector<4x512xf32>
    %c0_2 = arith.constant 0 : index
    %c0_3 = arith.constant 0 : index
    %7 = vector.load %arg2[%c0_2, %c0_3] : memref<4x512xf32, #tpu.memory_space<vmem>>, vector<4x512xf32>
    tpu.vector_store %arg2[%c0_2, %c0_3], %6 {strides = array<i32>} : memref<4x512xf32, #tpu.memory_space<vmem>>, vector<4x512xf32>,
    return
  }
  func.func @transform_0(%arg0: i32) -> (i32, i32) {
    %c0_i32 = arith.constant 0 : i32
    %c0_i32_0 = arith.constant 0 : i32
    return %arg0, %c0_i32 : i32, i32
  }
  func.func @transform_1(%arg0: i32) -> (i32, i32) {
    %c0_i32 = arith.constant 0 : i32
    %c0_i32_0 = arith.constant 0 : i32
    return %arg0, %c0_i32 : i32, i32
  }
}

</mosaic_0001>

<bundles_post_ra>
// kernel: tpu_custom_call.1
= control target key start
LH: loop header
LB: loop body
LE: loop exit
PB: predicated region body
PF: predicated region fallthrough
CT: control target
= control target key end

     0   :  { %6 = vsyncpa [#allocation3], 0  ;;  %s160_s0 = inlined_call_operand.hbm [shape: f32[4,512], index: 0, kind: input, shape index: {}]   ;;  %s161_s1 = inlined_call_operand.hbm [shape: f32[4,512], index: 1, kind: output, shape index: {}]  }
   0x1   :  { %7 = vsyncpa [#allocation4], 0  ;;  %s13_s8 = sshll.u32 %s160_s0, 4  ;;  %s142_s9 = smov [#allocation2]   ;;  %s14_s8 = int_to_ptr.hbm [resolvable:$true] %s13_s8 }
   0x2   :  { %s15_s10 = sshll.u32 %s142_s9, 4  ;;  %s16_s10 = int_to_ptr.vmem [resolvable:$true] %s15_s10 }
   0x3   :  { %18 = dma.hbm_to_vmem [thread:$0]  %s14_s8, 256, %s16_s10, [#allocation3]  }
   0x4   :  { %138 = dma.done.wait [#allocation3], 256  }
   0x5   :  { %139 = vsyncadd [#allocation3], 4294967040  ;;  %v23_v0 = vld [vmem:[#allocation2] sm:$0xff]  ;;  %v24_v1 = vld [vmem:[#allocation2 + $0x8] sm:$0xff]  ;;  %s143_s0 = smov [#allocation5]   ;;  %s70_s14 = sshll.u32 %s161_s1, 4  ;;  %s71_s14 = int_to_ptr.hbm [resolvable:$true] %s70_s14 }
   0x6   :  { %v25_v2 = vsub.f32 0.0, %v23_v0  ;;  %v26_v3 = vsub.f32 0.0, %v24_v1  ;;  %s68_s11 = sshll.u32 %s143_s0, 4  ;;  %s69_s11 = int_to_ptr.vmem [resolvable:$true] %s68_s11 }
   0x8   :  { %v27_v4 = vmul.f32 1.442695, %v25_v2  ;;  %v29_v5 = vmul.f32 1.442695, %v26_v3 }
   0xa   :  { %82 = vpow2.f32 %v27_v4 }
   0xb   :  { %84 = vpow2.f32 %v29_v5 }
  0x10   :  { %v83_v6 = vpop.eup %82 }
  0x11   :  { %v85_v7 = vpop.eup %84  ;;  %v31_v8 = vadd.f32 1.0, %v83_v6 }
  0x12   :  { %v32_v9 = vadd.f32 1.0, %v85_v7 }
  0x13   :  { %86 = vrcp.f32 %v31_v8  ;;  %vm38_vm0 = vweird.f32 %v31_v8  ;;  %v44_v13 = vand.u32 2147483648, %v31_v8  ;;  %v42_v16 = vand.u32 2147483647, %v31_v8 }
  0x14   :  { %88 = vrcp.f32 %v32_v9  ;;  %v58_v17 = vand.u32 2147483648, %v32_v9  ;;  %vm52_vm2 = vweird.f32 %v32_v9  ;;  %v56_v19 = vand.u32 2147483647, %v32_v9 }
  0x15   :  { %v45_v21 = vor.u32 1.1754944e-38, %v44_v13  ;;  %vm43_vm5 = vcmp.eq.f32.partialorder %v42_v16, 8.507059e+37 }
  0x16   :  { %v59_v24 = vor.u32 1.1754944e-38, %v58_v17  ;;  %vm57_vm7 = vcmp.eq.f32.partialorder %v56_v19, 8.507059e+37 }
  0x19   :  { %v87_v10 = vpop.eup %86 }
  0x1a   :  { %v89_v11 = vpop.eup %88  ;;  %v34_v12 = vmul.f32 %v87_v10, %v31_v8  ;;  %vm39_vm1 = vweird.f32 %v87_v10 }
  0x1b   :  { %v48_v14 = vmul.f32 %v89_v11, %v32_v9  ;;  %vm53_vm3 = vweird.f32 %v89_v11  ;;  %vm40_vm4 = vmor %vm38_vm0, %vm39_vm1 }
  0x1c   :  { %v35_v15 = vsub.f32 1.0, %v34_v12  ;;  %vm54_vm6 = vmor %vm52_vm2, %vm53_vm3 }
  0x1d   :  { %v49_v18 = vsub.f32 1.0, %v48_v14 }
  0x1e   :  { %v36_v20 = vmul.f32 %v87_v10, %v35_v15 }
  0x1f   :  { %v50_v22 = vmul.f32 %v89_v11, %v49_v18 }
  0x20   :  { %v37_v23 = vadd.f32 %v87_v10, %v36_v20 }
  0x21   :  { %v51_v25 = vadd.f32 %v89_v11, %v50_v22 }
  0x22   :  { %v41_v26 = vsel %vm40_vm4, %v87_v10, %v37_v23 }
  0x23   :  { %v46_v27 = vsel %vm43_vm5, %v45_v21, %v41_v26  ;;  %v55_v28 = vsel %vm54_vm6, %v89_v11, %v51_v25 }
  0x24   :  { %61 = vst [vmem:[#allocation5] sm:$0xff] %v46_v27  ;;  %v60_v29 = vsel %vm57_vm7, %v59_v24, %v55_v28 }
  0x25   :  { %62 = vst [vmem:[#allocation5 + $0x8] sm:$0xff] %v60_v29 }
  0x26   :  { %73 = dma.vmem_to_hbm [thread:$0]  %s69_s11, 256, %s71_s14, [#allocation4]  }
  0x27   :  { %140 = dma.done.wait [#allocation4], 256  }
  0x28   :  { %141 = vsyncadd [#allocation4], 4294967040 }
  0x29   :  { %78 = vsyncpa [#allocation3], 1 }
  0x2a   :  { %79 = vsyncpa [#allocation4], 1 }

</bundles_post_ra>
